<compile_context>
chip_gen: v7x
topology: tpu7x:2x2x1
jax: 0.10.0
libtpu: 0.0.40
codegen_flags: <defaults>
</compile_context>

<pallas_src>
import functools

import jax
import jax.numpy as jnp
from jax.experimental import pallas as pl
from jax.experimental.pallas import tpu as pltpu

NORM_EPS = 1e-12   # F.normalize clamps ||x|| at eps=1e-12
EPS = 1e-10


def _supcon_kernel(q_ref, kt_ref, lab_q_ref, lab_k_ref, valid_ref, cnt_ref,
                   out_ref, denom_acc, possum_acc, *, inv_temp):
    """One (query-block, key-block) tile of the supervised contrastive loss.

    q_ref    : (TQ, D)   pre-normalized query rows
    kt_ref   : (D, TK)   pre-normalized, pre-transposed key columns
    lab_q_ref: (TQ, 1)   int32 query labels
    lab_k_ref: (1, TK)   int32 key labels
    valid_ref: (1, TK)   int32 1 for real columns, 0 for padding
    cnt_ref  : (TQ, 1)   f32 number of positives per query row (from XLA)
    out_ref  : (TQ, 1)   mean log-prob over positives (written at last k)
    denom_acc, possum_acc: (TQ, 1) f32 running sums across key blocks
    """
    k_idx = pl.program_id(1)
    nk = pl.num_programs(1)
    tq = q_ref.shape[0]
    tk = kt_ref.shape[1]

    @pl.when(k_idx == 0)
    def _init():
        denom_acc[...] = jnp.zeros_like(denom_acc)
        possum_acc[...] = jnp.zeros_like(possum_acc)

    # Plain NN matmul on the MXU (keys pre-transposed once in XLA).
    sim = jnp.dot(q_ref[...], kt_ref[...],
                  preferred_element_type=jnp.float32) * inv_temp      # (TQ, TK)

    # Positive mask (kept as bool): same label AND not the global diagonal.
    row0 = pl.program_id(0) * tq
    col0 = k_idx * tk
    row_gid = jax.lax.broadcasted_iota(jnp.int32, (tq, tk), 0) + row0
    col_gid = jax.lax.broadcasted_iota(jnp.int32, (tq, tk), 1) + col0
    same = lab_q_ref[...] == lab_k_ref[...]                           # (TQ, TK)
    pos = jnp.logical_and(same, row_gid != col_gid)
    valid_k = valid_ref[...] != 0                                     # (1, TK)

    exp_sim = jnp.exp(sim)

    # denominator contribution: sum_j exp(sim) over {valid & not positive}
    # (== neg_exp_sum + self_exp of the reference); single masked reduction.
    denom_acc[...] += jnp.sum(
        jnp.where(jnp.logical_and(valid_k, jnp.logical_not(pos)), exp_sim, 0.0),
        axis=1, keepdims=True)
    # positive-similarity contribution: sum_j sim over positives.
    possum_acc[...] += jnp.sum(jnp.where(pos, sim, 0.0),
                               axis=1, keepdims=True)

    @pl.when(k_idx == nk - 1)
    def _finalize():
        cnt = cnt_ref[...]                                            # (TQ, 1)
        log_denom = jnp.log(denom_acc[...] + EPS)
        # sum_j m*(sim - log d) = sum_j m*sim - (sum_j m)*log d, never builds
        # the (TQ, TK) log_prob slab.
        out_ref[...] = (possum_acc[...] - cnt * log_denom) / (cnt + EPS)


def _vmem_footprint_bytes(tq, tk, d, nk, feat_itemsize):
    kbuf = 1 if nk == 1 else 2               # resident keys are single-buffered
    b = 0
    b += 2 * tq * d * feat_itemsize          # query features (double-buffered)
    b += kbuf * d * tk * feat_itemsize       # key features
    b += kbuf * 2 * tk * 4                   # key label row + valid row
    b += 2 * tq * 4 * 2                      # query label col + pos_cnt col
    b += 2 * tq * 4                          # output block
    b += 2 * tq * 4                          # accumulator scratch
    b += 6 * tq * tk * 4                     # live (TQ, TK) f32 temporaries
    return b


_VMEM_BUDGET = 36 * 1024 * 1024              # conservative vs v7x's 64 MiB / TC


def _choose_tiling(n, d, feat_itemsize, max_key_block=None):
    tq = 256 if n > 128 else 128             # MXU-shaped M dim on all gens
    n_pad = ((n + tq - 1) // tq) * tq
    # Key-block candidates: multiples of 128 that divide n_pad, largest first.
    cands = [tk for tk in range(n_pad, 0, -128) if n_pad % tk == 0]
    tk_sel = cands[-1]
    for tk in cands:
        if max_key_block is not None and tk > max_key_block:
            continue
        nk = n_pad // tk
        if _vmem_footprint_bytes(tq, tk, d, nk, feat_itemsize) <= _VMEM_BUDGET:
            tk_sel = tk
            break
    return tq, n_pad, tk_sel


def supervised_contrastive_loss(features, labels, *, temperature=0.07,
                                use_bf16_matmul=False, max_key_block=None):
    """features: (N, D) float, labels: (N,) int -> scalar float32 loss."""
    n, d = features.shape
    f = features.astype(jnp.float32)

    # ----- XLA-side preprocessing (done once, hoisted out of the kernel) ----
    # L2 normalize (F.normalize semantics: x / max(||x||_2, 1e-12)).
    sq = jnp.sum(f * f, axis=1, keepdims=True)
    fn = f * jax.lax.rsqrt(jnp.maximum(sq, NORM_EPS * NORM_EPS))

    # Positives per row (same label, excluding self) from labels only.
    lab = labels.reshape(-1).astype(jnp.int32)
    pos_cnt = jnp.sum((lab[:, None] == lab[None, :]).astype(jnp.float32),
                      axis=1) - 1.0

    feat_dtype = jnp.bfloat16 if use_bf16_matmul else jnp.float32
    feat_itemsize = 2 if use_bf16_matmul else 4
    tq, n_pad, tk = _choose_tiling(n, d, feat_itemsize, max_key_block)
    nq, nk = n_pad // tq, n_pad // tk

    pad = n_pad - n
    fn_pad = jnp.pad(fn, ((0, pad), (0, 0)))                  # padded rows = 0
    q_feats = fn_pad.astype(feat_dtype)                       # (N_pad, D)
    k_feats_t = fn_pad.T.astype(feat_dtype)                   # (D, N_pad)
    lab_col = jnp.pad(lab, (0, pad)).reshape(n_pad, 1)
    lab_row = lab_col.reshape(1, n_pad)
    valid_row = (jnp.arange(n_pad, dtype=jnp.int32) < n
                 ).astype(jnp.int32).reshape(1, n_pad)
    cnt_col = jnp.pad(pos_cnt, (0, pad)).reshape(n_pad, 1)

    # Constant-index (resident) key-side inputs are single-buffered.
    resident = nk == 1

    def _key_spec(shape, index_map):
        if resident:
            return pl.BlockSpec(shape, index_map, pipeline_mode=pl.Buffered(1))
        return pl.BlockSpec(shape, index_map)

    footprint = _vmem_footprint_bytes(tq, tk, d, nk, feat_itemsize)
    vmem_limit = max(min(int(1.5 * footprint) + (4 << 20), 60 << 20), 16 << 20)

    kernel = functools.partial(_supcon_kernel, inv_temp=1.0 / temperature)

    mlpp = pl.pallas_call(
        kernel,
        out_shape=jax.ShapeDtypeStruct((n_pad, 1), jnp.float32),
        grid=(nq, nk),
        in_specs=[
            pl.BlockSpec((tq, d), lambda i, k: (i, 0)),       # query features
            _key_spec((d, tk), lambda i, k: (0, k)),          # key features^T
            pl.BlockSpec((tq, 1), lambda i, k: (i, 0)),       # query labels
            _key_spec((1, tk), lambda i, k: (0, k)),          # key labels
            _key_spec((1, tk), lambda i, k: (0, k)),          # key-valid mask
            pl.BlockSpec((tq, 1), lambda i, k: (i, 0)),       # positives / row
        ],
        out_specs=pl.BlockSpec((tq, 1), lambda i, k: (i, 0)),
        scratch_shapes=[pltpu.VMEM((tq, 1), jnp.float32),
                        pltpu.VMEM((tq, 1), jnp.float32)],
        compiler_params=pltpu.CompilerParams(
            dimension_semantics=("parallel", "arbitrary"),
            vmem_limit_bytes=int(vmem_limit)),
    )(q_feats, k_feats_t, lab_col, lab_row, valid_row, cnt_col)

    # Padded rows produce exactly 0; average over the real rows only.
    return -jnp.mean(mlpp[:n, 0])


def _reference_loss(features, labels):
    """Pure-JAX reference mirroring the PyTorch module (hard_mining=False)."""
    f = features.astype(jnp.float32)
    fn = f / jnp.maximum(jnp.linalg.norm(f, axis=1, keepdims=True), NORM_EPS)
    n = f.shape[0]
    sim = (fn @ fn.T) / 0.07
    mask = (labels[:, None] == labels[None, :]).astype(jnp.float32)
    diag = jnp.eye(n, dtype=jnp.float32)
    mask_pos = mask - diag
    mask_neg = 1.0 - mask
    exp_sim = jnp.exp(sim)
    neg_exp_sum = jnp.sum(exp_sim * mask_neg, axis=1, keepdims=True)
    self_exp = jnp.sum(diag * exp_sim, axis=1, keepdims=True)
    denom = neg_exp_sum + self_exp + EPS
    log_prob = sim - jnp.log(denom)
    pos_count = mask_pos.sum(axis=1) + EPS
    mean_log_prob_pos = (mask_pos * log_prob).sum(axis=1) / pos_count
    return -jnp.mean(mean_log_prob_pos)


if __name__ == "__main__":
    key = jax.random.PRNGKey(0)
    k1, k2 = jax.random.split(key)

    # Test 1: small batch — VMEM-resident key path (nk == 1, Buffered(1) keys).
    N, D = 8, 32
    features = jax.random.normal(k1, (N, D), dtype=jnp.float32)
    labels = jnp.array([0, 1, 2, 3, 0, 1, 2, 3], dtype=jnp.int32)
    loss = jax.block_until_ready(supervised_contrastive_loss(features, labels))
    ref = jax.block_until_ready(_reference_loss(features, labels))
    assert jnp.allclose(loss, ref, rtol=1e-4, atol=1e-4), (loss, ref)

    # Test 2: exercise the key-axis-tiled (flash-style) fallback path (nk > 1).
    N2, D2 = 192, 32
    features2 = jax.random.normal(k2, (N2, D2), dtype=jnp.float32)
    labels2 = jnp.arange(N2, dtype=jnp.int32) % 6
    loss2 = jax.block_until_ready(
        supervised_contrastive_loss(features2, labels2, max_key_block=128))
    ref2 = jax.block_until_ready(_reference_loss(features2, labels2))
    assert jnp.allclose(loss2, ref2, rtol=1e-4, atol=1e-4), (loss2, ref2)

    print("KERNEL_OK")
</pallas_src>

<mosaic_0001>
module attributes {stable_mosaic.version = 11 : i64} {
  func.func @_supcon_kernel(%arg0: i32, %arg1: i32, %arg2: memref<128x32xf32, #tpu.memory_space<vmem>>, %arg3: memref<32x128xf32, #tpu.memory_space<vmem>>, %arg4: memref<128x1xi32, #tpu.memory_space<vmem>>, %arg5: memref<1x128xi32, #tpu.memory_space<vmem>>, %arg6: memref<1x128xi32, #tpu.memory_space<vmem>>, %arg7: memref<128x1xf32, #tpu.memory_space<vmem>>, %arg8: memref<128x1xf32, #tpu.memory_space<vmem>>, %arg9: memref<128x1xf32, #tpu.memory_space<vmem>>, %arg10: memref<128x1xf32, #tpu.memory_space<vmem>>) attributes {dimension_semantics = [#tpu.dimension_semantics<parallel>, #tpu.dimension_semantics<arbitrary>], iteration_bounds = array<i64: 1, 1>, scalar_prefetch = 0 : i64, scratch_operands = 2 : i64, tpu.core_type = #tpu.core_type<tc>, window_params = [{transform_indices = @transform_0, window_bounds = array<i64: 128, 32>}, {pipeline_mode = #tpu.pipeline_mode<synchronous>, transform_indices = @transform_1, window_bounds = array<i64: 32, 128>}, {transform_indices = @transform_2, window_bounds = array<i64: 128, 1>}, {pipeline_mode = #tpu.pipeline_mode<synchronous>, transform_indices = @transform_3, window_bounds = array<i64: 1, 128>}, {pipeline_mode = #tpu.pipeline_mode<synchronous>, transform_indices = @transform_4, window_bounds = array<i64: 1, 128>}, {transform_indices = @transform_5, window_bounds = array<i64: 128, 1>}, {transform_indices = @transform_6, window_bounds = array<i64: 128, 1>}]} {
    %c0_i32 = arith.constant 0 : i32
    %0 = arith.cmpi eq, %arg1, %c0_i32 : i32
    %1 = arith.extui %0 : i1 to i32
    %c0_i32_0 = arith.constant 0 : i32
    %2 = arith.cmpi ne, %1, %c0_i32_0 : i32
    scf.if %2 {
      %cst_28 = arith.constant 0.000000e+00 : f32
      %47 = vector.broadcast %cst_28 : f32 to vector<128x1xf32>
      %c0_29 = arith.constant 0 : index
      %c0_30 = arith.constant 0 : index
      %48 = vector.load %arg9[%c0_29, %c0_30] : memref<128x1xf32, #tpu.memory_space<vmem>>, vector<128x1xf32>
      tpu.vector_store %arg9[%c0_29, %c0_30], %47 {strides = array<i32>} : memref<128x1xf32, #tpu.memory_space<vmem>>, vector<128x1xf32>,
      %cst_31 = arith.constant 0.000000e+00 : f32
      %49 = vector.broadcast %cst_31 : f32 to vector<128x1xf32>
      %c0_32 = arith.constant 0 : index
      %c0_33 = arith.constant 0 : index
      %50 = vector.load %arg10[%c0_32, %c0_33] : memref<128x1xf32, #tpu.memory_space<vmem>>, vector<128x1xf32>
      tpu.vector_store %arg10[%c0_32, %c0_33], %49 {strides = array<i32>} : memref<128x1xf32, #tpu.memory_space<vmem>>, vector<128x1xf32>,
    } else {
    }
    %c0 = arith.constant 0 : index
    %c0_1 = arith.constant 0 : index
    %3 = vector.load %arg2[%c0, %c0_1] : memref<128x32xf32, #tpu.memory_space<vmem>>, vector<128x32xf32>
    %c0_2 = arith.constant 0 : index
    %c0_3 = arith.constant 0 : index
    %4 = vector.load %arg3[%c0_2, %c0_3] : memref<32x128xf32, #tpu.memory_space<vmem>>, vector<32x128xf32>
    %cst = arith.constant dense<0.000000e+00> : vector<128x128xf32>
    %5 = tpu.matmul %3, %4, %cst {dimension_numbers = #tpu.dot_dimension_numbers<[1], [0], [0], [1], [0, 0, 1, 1], [], []>} : vector<128x32xf32>, vector<32x128xf32>, vector<128x128xf32> -> vector<128x128xf32>
    %cst_4 = arith.constant 14.2857141 : f32
    %6 = vector.broadcast %cst_4 : f32 to vector<128x128xf32>
    %7 = arith.mulf %5, %6 : vector<128x128xf32>
    %c128_i32 = arith.constant 128 : i32
    %8 = arith.muli %arg0, %c128_i32 : i32
    %c128_i32_5 = arith.constant 128 : i32
    %9 = arith.muli %arg1, %c128_i32_5 : i32
    %10 = tpu.iota {dimensions = array<i32: 0>} : vector<128x128xi32>
    %11 = vector.broadcast %8 : i32 to vector<128x128xi32>
    %12 = arith.addi %10, %11 : vector<128x128xi32>
    %13 = tpu.iota {dimensions = array<i32: 1>} : vector<128x128xi32>
    %14 = vector.broadcast %9 : i32 to vector<128x128xi32>
    %15 = arith.addi %13, %14 : vector<128x128xi32>
    %c0_6 = arith.constant 0 : index
    %c0_7 = arith.constant 0 : index
    %16 = vector.load %arg4[%c0_6, %c0_7] : memref<128x1xi32, #tpu.memory_space<vmem>>, vector<128x1xi32>
    %c0_8 = arith.constant 0 : index
    %c0_9 = arith.constant 0 : index
    %17 = vector.load %arg5[%c0_8, %c0_9] : memref<1x128xi32, #tpu.memory_space<vmem>>, vector<1x128xi32>
    %18 = vector.broadcast %16 : vector<128x1xi32> to vector<128x128xi32>
    %19 = vector.broadcast %17 : vector<1x128xi32> to vector<128x128xi32>
    %20 = arith.cmpi eq, %18, %19 : vector<128x128xi32>
    %21 = arith.cmpi ne, %12, %15 : vector<128x128xi32>
    %22 = arith.andi %20, %21 : vector<128x128xi1>
    %c0_10 = arith.constant 0 : index
    %c0_11 = arith.constant 0 : index
    %23 = vector.load %arg6[%c0_10, %c0_11] : memref<1x128xi32, #tpu.memory_space<vmem>>, vector<1x128xi32>
    %c0_i32_12 = arith.constant 0 : i32
    %24 = vector.broadcast %c0_i32_12 : i32 to vector<1x128xi32>
    %25 = arith.cmpi ne, %23, %24 : vector<1x128xi32>
    %26 = math.exp %7 : vector<128x128xf32>
    %c0_13 = arith.constant 0 : index
    %c0_14 = arith.constant 0 : index
    %27 = vector.load %arg9[%c0_13, %c0_14] : memref<128x1xf32, #tpu.memory_space<vmem>>, vector<128x1xf32>
    %cst_15 = arith.constant dense<true> : vector<128x128xi1>
    %28 = arith.xori %22, %cst_15 : vector<128x128xi1>
    %29 = vector.broadcast %25 : vector<1x128xi1> to vector<128x128xi1>
    %30 = arith.andi %29, %28 : vector<128x128xi1>
    %cst_16 = arith.constant 0.000000e+00 : f32
    %31 = vector.broadcast %cst_16 : f32 to vector<128x128xf32>
    %32 = arith.select %30, %26, %31 : vector<128x128xi1>, vector<128x128xf32>
    %cst_17 = arith.constant dense<0.000000e+00> : vector<128xf32>
    %33 = vector.multi_reduction <add>, %32, %cst_17 [1] : vector<128x128xf32> to vector<128xf32>
    %34 = vector.shape_cast %33 : vector<128xf32> to vector<128x1xf32>
    %35 = arith.addf %27, %34 : vector<128x1xf32>
    %c0_18 = arith.constant 0 : index
    %c0_19 = arith.constant 0 : index
    %36 = vector.load %arg9[%c0_18, %c0_19] : memref<128x1xf32, #tpu.memory_space<vmem>>, vector<128x1xf32>
    tpu.vector_store %arg9[%c0_18, %c0_19], %35 {strides = array<i32>} : memref<128x1xf32, #tpu.memory_space<vmem>>, vector<128x1xf32>,
    %c0_20 = arith.constant 0 : index
    %c0_21 = arith.constant 0 : index
    %37 = vector.load %arg10[%c0_20, %c0_21] : memref<128x1xf32, #tpu.memory_space<vmem>>, vector<128x1xf32>
    %cst_22 = arith.constant 0.000000e+00 : f32
    %38 = vector.broadcast %cst_22 : f32 to vector<128x128xf32>
    %39 = arith.select %22, %7, %38 : vector<128x128xi1>, vector<128x128xf32>
    %cst_23 = arith.constant dense<0.000000e+00> : vector<128xf32>
    %40 = vector.multi_reduction <add>, %39, %cst_23 [1] : vector<128x128xf32> to vector<128xf32>
    %41 = vector.shape_cast %40 : vector<128xf32> to vector<128x1xf32>
    %42 = arith.addf %37, %41 : vector<128x1xf32>
    %c0_24 = arith.constant 0 : index
    %c0_25 = arith.constant 0 : index
    %43 = vector.load %arg10[%c0_24, %c0_25] : memref<128x1xf32, #tpu.memory_space<vmem>>, vector<128x1xf32>
    tpu.vector_store %arg10[%c0_24, %c0_25], %42 {strides = array<i32>} : memref<128x1xf32, #tpu.memory_space<vmem>>, vector<128x1xf32>,
    %c0_i32_26 = arith.constant 0 : i32
    %44 = arith.cmpi eq, %arg1, %c0_i32_26 : i32
    %45 = arith.extui %44 : i1 to i32
    %c0_i32_27 = arith.constant 0 : i32
    %46 = arith.cmpi ne, %45, %c0_i32_27 : i32
    scf.if %46 {
      %c0_28 = arith.constant 0 : index
      %c0_29 = arith.constant 0 : index
      %47 = vector.load %arg7[%c0_28, %c0_29] : memref<128x1xf32, #tpu.memory_space<vmem>>, vector<128x1xf32>
      %c0_30 = arith.constant 0 : index
      %c0_31 = arith.constant 0 : index
      %48 = vector.load %arg9[%c0_30, %c0_31] : memref<128x1xf32, #tpu.memory_space<vmem>>, vector<128x1xf32>
      %cst_32 = arith.constant 1.000000e-10 : f32
      %49 = vector.broadcast %cst_32 : f32 to vector<128x1xf32>
      %50 = arith.addf %48, %49 : vector<128x1xf32>
      %51 = math.log %50 : vector<128x1xf32>
      %c0_33 = arith.constant 0 : index
      %c0_34 = arith.constant 0 : index
      %52 = vector.load %arg10[%c0_33, %c0_34] : memref<128x1xf32, #tpu.memory_space<vmem>>, vector<128x1xf32>
      %53 = arith.mulf %47, %51 : vector<128x1xf32>
      %54 = arith.subf %52, %53 : vector<128x1xf32>
      %cst_35 = arith.constant 1.000000e-10 : f32
      %55 = vector.broadcast %cst_35 : f32 to vector<128x1xf32>
      %56 = arith.addf %47, %55 : vector<128x1xf32>
      %57 = arith.divf %54, %56 : vector<128x1xf32>
      %c0_36 = arith.constant 0 : index
      %c0_37 = arith.constant 0 : index
      %58 = vector.load %arg8[%c0_36, %c0_37] : memref<128x1xf32, #tpu.memory_space<vmem>>, vector<128x1xf32>
      tpu.vector_store %arg8[%c0_36, %c0_37], %57 {strides = array<i32>} : memref<128x1xf32, #tpu.memory_space<vmem>>, vector<128x1xf32>,
    } else {
    }
    return
  }
  func.func @transform_0(%arg0: i32, %arg1: i32) -> (i32, i32) {
    %c0_i32 = arith.constant 0 : i32
    %c0_i32_0 = arith.constant 0 : i32
    return %arg0, %c0_i32 : i32, i32
  }
  func.func @transform_1(%arg0: i32, %arg1: i32) -> (i32, i32) {
    %c0_i32 = arith.constant 0 : i32
    %c0_i32_0 = arith.constant 0 : i32
    return %c0_i32, %arg1 : i32, i32
  }
  func.func @transform_2(%arg0: i32, %arg1: i32) -> (i32, i32) {
    %c0_i32 = arith.constant 0 : i32
    %c0_i32_0 = arith.constant 0 : i32
    return %arg0, %c0_i32 : i32, i32
  }
  func.func @transform_3(%arg0: i32, %arg1: i32) -> (i32, i32) {
    %c0_i32 = arith.constant 0 : i32
    %c0_i32_0 = arith.constant 0 : i32
    return %c0_i32, %arg1 : i32, i32
  }
  func.func @transform_4(%arg0: i32, %arg1: i32) -> (i32, i32) {
    %c0_i32 = arith.constant 0 : i32
    %c0_i32_0 = arith.constant 0 : i32
    return %c0_i32, %arg1 : i32, i32
  }
  func.func @transform_5(%arg0: i32, %arg1: i32) -> (i32, i32) {
    %c0_i32 = arith.constant 0 : i32
    %c0_i32_0 = arith.constant 0 : i32
    return %arg0, %c0_i32 : i32, i32
  }
  func.func @transform_6(%arg0: i32, %arg1: i32) -> (i32, i32) {
    %c0_i32 = arith.constant 0 : i32
    %c0_i32_0 = arith.constant 0 : i32
    return %arg0, %c0_i32 : i32, i32
  }
}

</mosaic_0001>

<bundles_post_ra>
// kernel: tpu_custom_call.1
= control target key start
LH: loop header
LB: loop body
LE: loop exit
PB: predicated region body
PF: predicated region fallthrough
CT: control target
= control target key end

     0   :  { %vm80_vm0 = vcmask 261120   ;;  %v1093_v3 = vmov 0   ;;  %vm2064_vm1 = vcmask 7168   ;;  %v1094_v39 = vmov 0.0   ;;  %s2057_s1 = inlined_call_operand.vmem [shape: f32[32,128], index: 1, kind: input, shape index: {}]   ;;  %s2058_s0 = inlined_call_operand.vmem [shape: f32[128,32], index: 0, kind: input, shape index: {}]   ;;  %s2059_s2 = inlined_call_operand.vmem [shape: s32[128,1], index: 2, kind: input, shape index: {}]   ;;  %s2060_s4 = inlined_call_operand.vmem [shape: s32[1,128], index: 4, kind: input, shape index: {}]   ;;  %s2061_s3 = inlined_call_operand.vmem [shape: s32[1,128], index: 3, kind: input, shape index: {}]   ;;  %s2062_s5 = inlined_call_operand.vmem [shape: f32[128,1], index: 5, kind: input, shape index: {}]   ;;  %s2063_s6 = inlined_call_operand.vmem [shape: f32[128,1], index: 6, kind: output, shape index: {}]  }
   0x1   :  { %v76_v0 = vld [vmem:[%s2057_s1] sm:$0xff]  ;;  %v77_v1 = vld [vmem:[%s2057_s1 + $0x8] sm:$0xff]  ;;  %v78_v2 = vld [vmem:[%s2057_s1 + $0x10] sm:$0xff]  ;;  %996 = vset.pattern.permute.xlu1 %v1093_v3  ;;  %995 = vset.pattern.permute.xlu0 %v1093_v3  ;;  %45 = vst.msk [vmem:[#allocation3 + $0x8] sm:$0xff] %vm2064_vm1, %v1094_v39  ;;  %v292_v46 = vlaneseq }
   0x2   :  { %v980_v4 = vpack.c.bf16 %v77_v1, %v76_v0  ;;  %v79_v5 = vld [vmem:[%s2057_s1 + $0x18] sm:$0xff]  ;;  %v60_v6 = vld [vmem:[%s2058_s0] sm:$0xff]  ;;  %v332_v9 = vld [vmem:[%s2059_s2 + $0x10] sm:$0xff]  ;;  %28 = vst.msk [vmem:[#allocation2] sm:$0xff] %vm2064_vm1, %v1094_v39 }
   0x3   :  { %v68_v7 = vld [vmem:[%s2058_s0 + $0x40] sm:$0xff]  ;;  %v984_v8 = vpack.c.bf16 %v79_v5, %v78_v2  ;;  %956 = vmatprep.mubr.msk.f32.mxu0 %vm80_vm0, %v60_v6  ;;  %v61_v11 = vld [vmem:[%s2058_s0 + $0x8] sm:$0xff]  ;;  %v62_v13 = vld [vmem:[%s2058_s0 + $0x10] sm:$0xff]  ;;  %354 = vperm.xlu1 %996, %v332_v9   ;;  %29 = vst.msk [vmem:[#allocation2 + $0x8] sm:$0xff] %vm2064_vm1, %v1094_v39  ;;  %v293_v49 = vshrl.u32 %v292_v46, 7  ;;  %v1303_v54 = vand.u32 127, %v292_v46 }
   0x4   :  { %968 = vmatprep.mubr.msk.f32.mxu1 %vm80_vm0, %v68_v7  ;;  %981 = vmatprep.subr.bf16.mxu0 %v980_v4  ;;  %v330_v10 = vld [vmem:[%s2059_s2] sm:$0xff]  ;;  %v69_v12 = vld [vmem:[%s2058_s0 + $0x48] sm:$0xff]  ;;  %v70_v14 = vld [vmem:[%s2058_s0 + $0x50] sm:$0xff]  ;;  %30 = vst.msk [vmem:[#allocation2 + $0x10] sm:$0xff] %vm2064_vm1, %v1094_v39 }
   0x5   :  { %988 = vmatprep.subr.bf16.mxu1 %v980_v4  ;;  %983 = vmatpush3.bf16.msra.mxu0 %v980_v4  ;;  %v333_v15 = vld [vmem:[%s2059_s2 + $0x18] sm:$0xff]  ;;  %v331_v16 = vld [vmem:[%s2059_s2 + $0x8] sm:$0xff]  ;;  %v64_v19 = vld [vmem:[%s2058_s0 + $0x20] sm:$0xff]  ;;  %31 = vst.msk [vmem:[#allocation2 + $0x18] sm:$0xff] %vm2064_vm1, %v1094_v39  ;;  %v516_v52 = vsub.s32 0, %v293_v49  ;;  %v294_v55 = vadd.s32 8, %v293_v49  ;;  %vm415_vm4 = vcmp.ne.s32.totalorder %v293_v49, %v1303_v54 }
   0x6   :  { %990 = vmatpush3.bf16.msra.mxu1 %v980_v4  ;;  %985 = vmatprep.subr.bf16.mxu0 %v984_v8  ;;  %v63_v17 = vld [vmem:[%s2058_s0 + $0x18] sm:$0xff]  ;;  %v72_v20 = vld [vmem:[%s2058_s0 + $0x60] sm:$0xff]  ;;  %v335_v21 = vld [vmem:[%s2059_s2 + $0x28] sm:$0xff]  ;;  %32 = vst.msk [vmem:[#allocation2 + $0x20] sm:$0xff] %vm2064_vm1, %v1094_v39  ;;  %v296_v58 = vadd.s32 24, %v293_v49  ;;  %v1316_v60 = vadd.s32 56, %v293_v49 }
   0x7   :  { %989 = vmatprep.subr.bf16.mxu1 %v984_v8  ;;  %348 = vperm.xlu0 %995, %v330_v10   ;;  %v71_v18 = vld [vmem:[%s2058_s0 + $0x58] sm:$0xff]  ;;  %v334_v22 = vld [vmem:[%s2059_s2 + $0x20] sm:$0xff]  ;;  %v65_v23 = vld [vmem:[%s2058_s0 + $0x28] sm:$0xff]  ;;  %33 = vst.msk [vmem:[#allocation2 + $0x28] sm:$0xff] %vm2064_vm1, %v1094_v39  ;;  %vm416_vm6 = vcmp.ne.s32.totalorder %v294_v55, %v1303_v54  ;;  %v295_v62 = vadd.s32 16, %v293_v49  ;;  %v297_v63 = vadd.s32 32, %v293_v49 }
   0x8   :  { %357 = vperm.xlu1 %996, %v333_v15   ;;  %v73_v24 = vld [vmem:[%s2058_s0 + $0x68] sm:$0xff]  ;;  %v66_v25 = vld [vmem:[%s2058_s0 + $0x30] sm:$0xff]  ;;  %v337_v27 = vld [vmem:[%s2059_s2 + $0x38] sm:$0xff]  ;;  %34 = vst.msk [vmem:[#allocation2 + $0x30] sm:$0xff] %vm2064_vm1, %v1094_v39  ;;  %v1322_v0 = vadd.s32 48, %v293_v49  ;;  %v302_v1 = vadd.s32 72, %v293_v49  ;;  %vm418_vm9 = vcmp.ne.s32.totalorder %v296_v58, %v1303_v54 }
   0x9   :  { %987 = vmatpush3.bf16.msra.mxu0 %v984_v8  ;;  %v74_v26 = vld [vmem:[%s2058_s0 + $0x70] sm:$0xff]  ;;  %v67_v29 = vld [vmem:[%s2058_s0 + $0x38] sm:$0xff]  ;;  %v339_v31 = vld [vmem:[%s2059_s2 + $0x48] sm:$0xff]  ;;  %35 = vst.msk [vmem:[#allocation2 + $0x38] sm:$0xff] %vm2064_vm1, %v1094_v39  ;;  %v301_v2 = vadd.s32 64, %v293_v49  ;;  %v1331_v5 = vadd.s32 80, %v293_v49  ;;  %vm417_vm14 = vcmp.ne.s32.totalorder %v295_v62, %v1303_v54  ;;  %vm419_vm15 = vcmp.ne.s32.totalorder %v297_v63, %v1303_v54 }
   0xa   :  { %991 = vmatpush3.bf16.msra.mxu1 %v984_v8  ;;  %v336_v28 = vld [vmem:[%s2059_s2 + $0x30] sm:$0xff]  ;;  %v75_v30 = vld [vmem:[%s2058_s0 + $0x78] sm:$0xff]  ;;  %v338_v32 = vld [vmem:[%s2059_s2 + $0x40] sm:$0xff]  ;;  %36 = vst.msk [vmem:[#allocation2 + $0x40] sm:$0xff] %vm2064_vm1, %v1094_v39  ;;  %v298_v6 = vadd.s32 40, %v293_v49  ;;  %v1335_v8 = vadd.s32 104, %v293_v49 }
   0xb   :  { %351 = vperm.xlu0 %995, %v331_v16   ;;  %v341_v33 = vld [vmem:[%s2059_s2 + $0x58] sm:$0xff]  ;;  %v340_v34 = vld [vmem:[%s2059_s2 + $0x50] sm:$0xff]  ;;  %v343_v35 = vld [vmem:[%s2059_s2 + $0x68] sm:$0xff]  ;;  %37 = vst.msk [vmem:[#allocation2 + $0x48] sm:$0xff] %vm2064_vm1, %v1094_v39  ;;  %v1337_v9 = vadd.s32 96, %v293_v49  ;;  %v1339_v10 = vadd.s32 120, %v293_v49 }
   0xc   :  { %957 = vmatmul.mubr.msk.f32.vlgmr.msra.gmra.mrb[0].mxu0 %vm80_vm0, %v61_v11  ;;  %363 = vperm.xlu1 %996, %v335_v21   ;;  %v342_v36 = vld [vmem:[%s2059_s2 + $0x60] sm:$0xff]  ;;  %v345_v37 = vld [vmem:[%s2059_s2 + $0x78] sm:$0xff]  ;;  %v344_v38 = vld [vmem:[%s2059_s2 + $0x70] sm:$0xff]  ;;  %38 = vst.msk [vmem:[#allocation2 + $0x50] sm:$0xff] %vm2064_vm1, %v1094_v39  ;;  %v1383_v15 = vadd.s32 112, %v293_v49  ;;  %v2115_v58 = vmov 0 }
   0xd   :  { %969 = vmatmul.mubr.msk.f32.vlgmr.msra.gmra.mrb[0].mxu1 %vm80_vm0, %v69_v12  ;;  %959 = vmatprep.mubr.msk.f32.mxu0 %vm80_vm0, %v62_v13  ;;  %39 = vst.msk [vmem:[#allocation2 + $0x58] sm:$0xff] %vm2064_vm1, %v1094_v39  ;;  %40 = vst.msk [vmem:[#allocation2 + $0x60] sm:$0xff] %vm2064_vm1, %v1094_v39  ;;  %v447_v48 = vld [vmem:[%s2060_s4] sm:$0x1]  ;;  %v2128_v12 = vmov 0 }
   0xe   :  { %971 = vmatprep.mubr.msk.f32.mxu1 %vm80_vm0, %v70_v14  ;;  %41 = vst.msk [vmem:[#allocation2 + $0x68] sm:$0xff] %vm2064_vm1, %v1094_v39  ;;  %42 = vst.msk [vmem:[#allocation2 + $0x70] sm:$0xff] %vm2064_vm1, %v1094_v39  ;;  %vm448_vm2 = vcmp.ne.s32.totalorder %v447_v48, 0  ;;  %v1308_v56 = vld [vmem:[%s2061_s3] ss:$0 sm:$0xff] }
   0xf   :  { %360 = vperm.xlu0 %995, %v334_v22   ;;  %43 = vst.msk [vmem:[#allocation2 + $0x78] sm:$0xff] %vm2064_vm1, %v1094_v39  ;;  %44 = vst.msk [vmem:[#allocation3] sm:$0xff] %vm2064_vm1, %v1094_v39  ;;  %v513_v53 = vsel %vm448_vm2, 1, %v1093_v3  ;;  %v1324_v3 = vadd.s32 88, %v293_v49 }
  0x10   :  { %960 = vmatmul.mubr.msk.f32.gmra.mrb[2].mxu0 %vm80_vm0, %v63_v17  ;;  %369 = vperm.xlu1 %996, %v337_v27   ;;  %46 = vst.msk [vmem:[#allocation3 + $0x10] sm:$0xff] %vm2064_vm1, %v1094_v39  ;;  %47 = vst.msk [vmem:[#allocation3 + $0x18] sm:$0xff] %vm2064_vm1, %v1094_v39  ;;  %v1314_v59 = vrot.slane %v513_v53, %v516_v52  ;;  %v2107_v53 = vmov 0 }
  0x11   :  { %972 = vmatmul.mubr.msk.f32.gmra.mrb[2].mxu1 %vm80_vm0, %v71_v18  ;;  %962 = vmatprep.mubr.msk.f32.mxu0 %vm80_vm0, %v64_v19  ;;  %48 = vst.msk [vmem:[#allocation3 + $0x20] sm:$0xff] %vm2064_vm1, %v1094_v39  ;;  %49 = vst.msk [vmem:[#allocation3 + $0x28] sm:$0xff] %vm2064_vm1, %v1094_v39  ;;  %v2138_v18 = vmov 0 }
  0x12   :  { %974 = vmatprep.mubr.msk.f32.mxu1 %vm80_vm0, %v72_v20  ;;  %50 = vst.msk [vmem:[#allocation3 + $0x30] sm:$0xff] %vm2064_vm1, %v1094_v39  ;;  %51 = vst.msk [vmem:[#allocation3 + $0x38] sm:$0xff] %vm2064_vm1, %v1094_v39 }
  0x13   :  { %366 = vperm.xlu0 %995, %v336_v28   ;;  %52 = vst.msk [vmem:[#allocation3 + $0x40] sm:$0xff] %vm2064_vm1, %v1094_v39  ;;  %53 = vst.msk [vmem:[#allocation3 + $0x48] sm:$0xff] %vm2064_vm1, %v1094_v39 }
  0x14   :  { %963 = vmatmul.mubr.msk.f32.gmra.mrb[4].mxu0 %vm80_vm0, %v65_v23  ;;  %375 = vperm.xlu1 %996, %v339_v31   ;;  %54 = vst.msk [vmem:[#allocation3 + $0x50] sm:$0xff] %vm2064_vm1, %v1094_v39  ;;  %55 = vst.msk [vmem:[#allocation3 + $0x58] sm:$0xff] %vm2064_vm1, %v1094_v39 }
  0x15   :  { %975 = vmatmul.mubr.msk.f32.gmra.mrb[4].mxu1 %vm80_vm0, %v73_v24  ;;  %965 = vmatprep.mubr.msk.f32.mxu0 %vm80_vm0, %v66_v25  ;;  %56 = vst.msk [vmem:[#allocation3 + $0x60] sm:$0xff] %vm2064_vm1, %v1094_v39  ;;  %57 = vst.msk [vmem:[#allocation3 + $0x68] sm:$0xff] %vm2064_vm1, %v1094_v39  ;;  %v2090_v25 = vmov 0 }
  0x16   :  { %977 = vmatprep.mubr.msk.f32.mxu1 %vm80_vm0, %v74_v26  ;;  %58 = vst.msk [vmem:[#allocation3 + $0x70] sm:$0xff] %vm2064_vm1, %v1094_v39  ;;  %59 = vst.msk [vmem:[#allocation3 + $0x78] sm:$0xff] %vm2064_vm1, %v1094_v39 }
  0x17   :  { %372 = vperm.xlu0 %995, %v338_v32  }
  0x18   :  { %966 = vmatmul.mubr.msk.f32.gmra.mrb[6].mxu0 %vm80_vm0, %v67_v29  ;;  %381 = vperm.xlu1 %996, %v341_v33  }
  0x19   :  { %978 = vmatmul.mubr.msk.f32.gmra.mrb[6].mxu1 %vm80_vm0, %v75_v30  ;;  %vm2065_vm0 = vmmov 1  }
  0x1b   :  { %378 = vperm.xlu0 %995, %v340_v34   ;;  %v2099_v34 = vmov 0 }
  0x1c   :  { %387 = vperm.xlu1 %996, %v343_v35  }
  0x1f   :  { %384 = vperm.xlu0 %995, %v342_v36  }
  0x20   :  { %393 = vperm.xlu1 %996, %v345_v37  }
  0x23   :  { %390 = vperm.xlu0 %995, %v344_v38  }
  0x82   :  { %v1289_v40 = vpop.permute.xlu1 %354 }
  0x83   :  { %vm401_vm12 = vcmp.eq.s32.totalorder %v1289_v40, %v1308_v56 }
  0x86   :  { %v349_v41 = vpop.permute.xlu0 %348 }
  0x87   :  { %v358_v42 = vpop.permute.xlu1 %357  ;;  %vm399_vm3 = vcmp.eq.s32.totalorder %v349_v41, %v1308_v56 }
  0x88   :  { %vm1326_vm7 = vmand %vm399_vm3, %vm415_vm4  ;;  %vm402_vm8 = vcmp.eq.s32.totalorder %v358_v42, %v1308_v56  ;;  %vm424_vm3 = vcmp.ne.s32.totalorder %v302_v1, %v1303_v54 }
  0x89   :  { %vm1358_vm2 = vmxor %vm1326_vm7, %vm2065_vm0 }
  0x8a   :  { %v352_v43 = vpop.permute.xlu0 %351  ;;  %vm1373_vm1 = vmand %vm402_vm8, %vm418_vm9 }
  0x8b   :  { %v1291_v44 = vpop.permute.xlu1 %363  ;;  %vm400_vm5 = vcmp.eq.s32.totalorder %v352_v43, %v1308_v56 }
  0x8c   :  { %vm1345_vm11 = vmand %vm400_vm5, %vm416_vm6  ;;  %vm404_vm10 = vcmp.eq.s32.totalorder %v1291_v44, %v1308_v56  ;;  %vm420_vm6 = vcmp.ne.s32.totalorder %v298_v6, %v1303_v54  ;;  %v2104_v44 = vmov 0 }
  0x8d   :  { %vm1389_vm8 = vmxor %vm1345_vm11, %vm2065_vm0 }
  0x8e   :  { %v1293_v45 = vpop.permute.xlu0 %360  ;;  %vm1404_vm5 = vmand %vm401_vm12, %vm417_vm14  ;;  %vm2097_vm14 = vcmp.ne.s32.totalorder %v301_v2, %v1303_v54 }
  0x8f   :  { %v1295_v47 = vpop.permute.xlu1 %369  ;;  %vm403_vm13 = vcmp.eq.s32.totalorder %v1293_v45, %v1308_v56 }
  0x90   :  { %vm1413_vm4 = vmand %vm403_vm13, %vm419_vm15 }
  0x92   :  { %v1300_v50 = vpop.permute.xlu0 %366 }
  0x93   :  { %v376_v51 = vpop.permute.xlu1 %375 }
  0x94   :  { %vm2089_vm9 = vcmp.eq.s32.totalorder %v376_v51, %v1308_v56 }
  0x95   :  { %vm1421_vm0 = vmand %vm2089_vm9, %vm424_vm3  ;;  %vm2094_vm9 = vmmov 1  }
  0x96   :  { %v1310_v57 = vpop.permute.xlu0 %372  ;;  %v2091_v25 = vsel %vm1421_vm0, 4294967295, %v2090_v25  ;;  %vm1442_vm3 = vmand %vm404_vm10, %vm420_vm6  ;;  %vm2103_vm6 = vcmp.ne.s32.totalorder %v1331_v5, %v1303_v54 }
  0x97   :  { %v1318_v61 = vpop.permute.xlu1 %381  ;;  %vm1449_vm13 = vmxor %vm1373_vm1, %vm2094_vm9 }
  0x9a   :  { %v379_v7 = vpop.permute.xlu0 %378 }
  0x9b   :  { %v1367_v13 = vpop.permute.xlu1 %387  ;;  %vm409_vm15 = vcmp.eq.s32.totalorder %v379_v7, %v1308_v56 }
  0x9c   :  { %vm1485_vm10 = vmand %vm409_vm15, %vm2103_vm6  ;;  %vm2106_vm15 = vcmp.eq.s32.totalorder %v1314_v59, 1 }
  0x9d   :  { %v2105_v44 = vsel %vm1485_vm10, 4294967295, %v2104_v44  ;;  %vm1498_vm6 = vmand %vm2106_vm15, %vm1389_vm8  ;;  %vm2113_vm8 = vcmp.ne.s32.totalorder %v1324_v3, %v1303_v54  ;;  %vm2114_vm15 = vcmp.eq.s32.totalorder %v1318_v61, %v1308_v56  ;;  %v2122_v3 = vmov 0 }
  0x9e   :  { %v385_v28 = vpop.permute.xlu0 %384  ;;  %v2108_v53 = vsel %vm1498_vm6, 4294967295, %v2107_v53 }
  0x9f   :  { %v394_v48 = vpop.permute.xlu1 %393 }
  0xa2   :  { %v391_v4 = vpop.permute.xlu0 %390 }
  0xdf   :  { %v958_v16 = vpop.f32.mrb[0].mxu0 }
  0xe0   :  { %v970_v17 = vpop.f32.mrb[0].mxu1  ;;  %v275_v19 = vmul.f32 14.285714, %v958_v16  ;;  %v195_v21 = vpop.f32.mrb[1].mxu0 }
  0xe1   :  { %v1397_v20 = vmul.f32 14.285714, %v970_v17  ;;  %v235_v22 = vpop.f32.mrb[1].mxu1  ;;  %v274_v26 = vmul.f32 14.285714, %v195_v21  ;;  %v2134_v17 = vmov 0 }
  0xe2   :  { %v1429_v27 = vmul.f32 14.285714, %v235_v22  ;;  %v451_v29 = vmul.f32 1.442695, %v275_v19  ;;  %v633_v31 = vsel %vm1345_vm11, %v275_v19, 0.0  ;;  %vm2098_vm11 = vcmp.eq.s32.totalorder %v1310_v57, %v1308_v56 }
  0xe3   :  { %v467_v30 = vmul.f32 1.442695, %v1397_v20  ;;  %vm1458_vm12 = vmand %vm2098_vm11, %vm2097_vm14  ;;  %v449_v35 = vmul.f32 1.442695, %v274_v26  ;;  %650 = vadd.xlane.f32.xlu0 %v633_v31  ;;  %v961_v38 = vpop.f32.mrb[2].mxu0  ;;  %v632_v42 = vsel %vm1326_vm7, %v274_v26, 0.0 }
  0xe4   :  { %v2100_v34 = vsel %vm1458_vm12, 4294967295, %v2099_v34  ;;  %v465_v36 = vmul.f32 1.442695, %v1429_v27  ;;  %v973_v37 = vpop.f32.mrb[2].mxu1  ;;  %997 = vpow2.f32 %v451_v29  ;;  %v277_v40 = vmul.f32 14.285714, %v961_v38  ;;  %vm1474_vm14 = vmxor %vm1421_vm0, %vm2094_vm9  ;;  %648 = vadd.xlane.f32.xlu1 %v632_v42 }
  0xe5   :  { %v1467_v39 = vmul.f32 14.285714, %v973_v37  ;;  %v245_v41 = vpop.f32.mrb[3].mxu1  ;;  %999 = vpow2.f32 %v467_v30  ;;  %v205_v46 = vpop.f32.mrb[3].mxu0  ;;  %vm1505_vm11 = vmxor %vm1458_vm12, %vm2094_vm9  ;;  %v2111_v57 = vmov 0 }
  0xe6   :  { %v1491_v45 = vmul.f32 14.285714, %v245_v41  ;;  %1001 = vpow2.f32 %v449_v35  ;;  %v455_v51 = vmul.f32 1.442695, %v277_v40  ;;  %v276_v52 = vmul.f32 14.285714, %v205_v46  ;;  %vm1512_vm7 = vmxor %vm1413_vm4, %vm2094_vm9 }
  0xe7   :  { %v471_v49 = vmul.f32 1.442695, %v1467_v39  ;;  %v2112_v57 = vsel %vm1512_vm7, 4294967295, %v2111_v57  ;;  %vm1522_vm0 = vmand %vm2114_vm15, %vm2113_vm8  ;;  %1003 = vpow2.f32 %v465_v36  ;;  %v635_v1 = vsel %vm1373_vm1, %v277_v40, 0.0  ;;  %v964_v2 = vpop.f32.mrb[4].mxu0  ;;  %v619_v36 = vld [vmem:[#allocation3 + $0x18] sm:$0xff] }
  0xe8   :  { %v2116_v58 = vsel %vm1522_vm0, 4294967295, %v2115_v58  ;;  %v469_v62 = vmul.f32 1.442695, %v1491_v45  ;;  %v976_v63 = vpop.f32.mrb[4].mxu1  ;;  %vm2117_vm7 = vcmp.eq.s32.totalorder %v1314_v59, 1  ;;  %vm2120_vm8 = vcmp.ne.s32.totalorder %v1335_v8, %v1303_v54  ;;  %654 = vadd.xlane.f32.xlu0 %v635_v1  ;;  %v215_v14 = vpop.f32.mrb[5].mxu0 }
  0xe9   :  { %vm1534_vm6 = vmand %vm2117_vm7, %vm1474_vm14  ;;  %vm2121_vm15 = vcmp.eq.s32.totalorder %v1367_v13, %v1308_v56  ;;  %1005 = vpow2.f32 %v471_v49  ;;  %v453_v5 = vmul.f32 1.442695, %v276_v52  ;;  %v1548_v6 = vmul.f32 14.285714, %v976_v63  ;;  %v255_v11 = vpop.f32.mrb[5].mxu1  ;;  %v484_v8 = vld [vmem:[#allocation2 + $0x18] sm:$0xff] }
  0xea   :  { %vm1544_vm12 = vmand %vm2121_vm15, %vm2120_vm8  ;;  %v279_v7 = vmul.f32 14.285714, %v964_v2  ;;  %1007 = vpow2.f32 %v455_v51  ;;  %v634_v13 = vsel %vm1404_vm5, %v276_v52, 0.0  ;;  %v1598_v21 = vmul.f32 14.285714, %v255_v11 }
  0xeb   :  { %v2123_v3 = vsel %vm1544_vm12, 4294967295, %v2122_v3  ;;  %vm2124_vm1 = vmmov %vm2117_vm7  ;;  %vm2133_vm7 = vcmp.eq.s32.totalorder %v1300_v50, %v1308_v56  ;;  %1009 = vpow2.f32 %v469_v62  ;;  %v475_v19 = vmul.f32 1.442695, %v1548_v6  ;;  %652 = vadd.xlane.f32.xlu1 %v634_v13  ;;  %v967_v26 = vpop.f32.mrb[6].mxu0 }
  0xec   :  { %vm1554_vm14 = vmand %vm2124_vm1, %vm1358_vm2  ;;  %1011 = vpow2.f32 %v453_v5  ;;  %v278_v50 = vmul.f32 14.285714, %v215_v14  ;;  %v979_v22 = vpop.f32.mrb[6].mxu1  ;;  %v473_v31 = vmul.f32 1.442695, %v1598_v21  ;;  %v225_v41 = vpop.f32.mrb[7].mxu0 }
  0xed   :  { %vm2127_vm15 = vmmov %vm2124_vm1  ;;  %vm2132_vm1 = vcmp.ne.s32.totalorder %v1322_v0, %v1303_v54  ;;  %v459_v0 = vmul.f32 1.442695, %v279_v7  ;;  %1013 = vpow2.f32 %v475_v19  ;;  %v1628_v33 = vmul.f32 14.285714, %v979_v22  ;;  %v265_v38 = vpop.f32.mrb[7].mxu1 }
  0xee   :  { %vm1567_vm12 = vmand %vm2127_vm15, %vm1505_vm11  ;;  %vm2136_vm11 = vcmp.ne.s32.totalorder %v1337_v9, %v1303_v54  ;;  %vm2137_vm15 = vcmp.eq.s32.totalorder %v385_v28, %v1308_v56  ;;  %v637_v9 = vsel %vm1442_vm3, %v279_v7, 0.0  ;;  %v1630_v35 = vmul.f32 14.285714, %v967_v26 }
  0xef   :  { %v2129_v12 = vsel %vm1567_vm12, 4294967295, %v2128_v12  ;;  %vm1574_vm2 = vmxor %vm1485_vm10, %vm2094_vm9  ;;  %vm2146_vm10 = vcmp.eq.s32.totalorder %v394_v48, %v1308_v56  ;;  %658 = vadd.xlane.f32.xlu0 %v637_v9  ;;  %1015 = vpow2.f32 %v459_v0  ;;  %v457_v37 = vmul.f32 1.442695, %v278_v50  ;;  %v620_v48 = vld [vmem:[#allocation3 + $0x20] sm:$0xff] }
  0xf0   :  { %vm1584_vm8 = vmand %vm2133_vm7, %vm2132_vm1  ;;  %vm2140_vm1 = vcmp.eq.s32.totalorder %v1314_v59, 1  ;;  %vm2145_vm7 = vcmp.ne.s32.totalorder %v1339_v10, %v1303_v54  ;;  %v636_v40 = vsel %vm1413_vm4, %v278_v50, 0.0  ;;  %1017 = vpow2.f32 %v473_v31 }
  0xf1   :  { %v2135_v17 = vsel %vm1584_vm8, 4294967295, %v2134_v17  ;;  %vm1593_vm12 = vmand %vm2137_vm15, %vm2136_vm11  ;;  %v479_v24 = vmul.f32 1.442695, %v1628_v33  ;;  %v463_v43 = vmul.f32 1.442695, %v1630_v35  ;;  %656 = vadd.xlane.f32.xlu1 %v636_v40  ;;  %vm2162_vm4 = vcmp.eq.s32.totalorder %v1314_v59, 1 }
  0xf2   :  { %v2139_v18 = vsel %vm1593_vm12, 4294967295, %v2138_v18  ;;  %vm1607_vm11 = vmand %vm2140_vm1, %vm1449_vm13  ;;  %v1670_v23 = vmul.f32 14.285714, %v265_v38  ;;  %1019 = vpow2.f32 %v457_v37 }
  0xf3   :  { %vm1614_vm15 = vmxor %vm1522_vm0, %vm2094_vm9  ;;  %1021 = vpow2.f32 %v479_v24 }
  0xf4   :  { %vm1623_vm8 = vmand %vm2146_vm10, %vm2145_vm7  ;;  %vm2152_vm10 = vcmp.ne.s32.totalorder %v1316_v60, %v1303_v54  ;;  %vm2153_vm7 = vcmp.eq.s32.totalorder %v1295_v47, %v1308_v56  ;;  %v998_v60 = vpop.eup %997  ;;  %v2160_v47 = vmov 0  ;;  %v477_v51 = vmul.f32 1.442695, %v1670_v23 }
  0xf5   :  { %vm2149_vm13 = vmmov %vm2140_vm1  ;;  %1023 = vpow2.f32 %v463_v43 }
  0xf6   :  { %vm1636_vm1 = vmand %vm2149_vm13, %vm1574_vm2  ;;  %vm2158_vm13 = vcmp.ne.s32.totalorder %v1383_v15, %v1303_v54  ;;  %v1680_v15 = vmul.f32 14.285714, %v225_v41  ;;  %1025 = vpow2.f32 %v477_v51 }
  0xf7   :  { %vm1646_vm0 = vmand %vm2153_vm7, %vm2152_vm10  ;;  %vm2159_vm10 = vcmp.eq.s32.totalorder %v391_v4, %v1308_v56  ;;  %v1000_v56 = vpop.eup %999 }
  0xf8   :  { %vm1655_vm2 = vmxor %vm1404_vm5, %vm2094_vm9  ;;  %v1002_v49 = vpop.eup %1001  ;;  %v544_v52 = vsel %vm1534_vm6, %v1000_v56, 0.0  ;;  %v461_v62 = vmul.f32 1.442695, %v1680_v15  ;;  %v639_v56 = vsel %vm1646_vm0, %v1630_v35, 0.0 }
  0xf9   :  { %vm1664_vm7 = vmand %vm2159_vm10, %vm2158_vm13  ;;  %vm2165_vm13 = vnez %v2108_v53  ;;  %v1004_v55 = vpop.eup %1003  ;;  %569 = vadd.xlane.f32.xlu0 %v544_v52  ;;  %v535_v63 = vsel %vm1554_vm14, %v1002_v49, 0.0  ;;  %v490_v53 = vld [vmem:[#allocation2 + $0x48] sm:$0xff] }
  0xfa   :  { %v2161_v47 = vsel %vm1664_vm7, 4294967295, %v2160_v47  ;;  %vm1676_vm5 = vmand %vm2162_vm4, %vm1614_vm15  ;;  %v536_v46 = vsel %vm2165_vm13, %v998_v60, 0.0  ;;  %vm2171_vm13 = vnez %v2112_v57  ;;  %v1006_v2 = vpop.eup %1005  ;;  %1027 = vpow2.f32 %v461_v62  ;;  %v489_v57 = vld [vmem:[#allocation2 + $0x40] sm:$0xff] }
  0xfb   :  { %vm1687_vm10 = vmxor %vm1593_vm12, %vm2094_vm9  ;;  %553 = vadd.xlane.f32.xlu1 %v536_v46  ;;  %v1008_v4 = vpop.eup %1007  ;;  %v546_v32 = vsel %vm1676_vm5, %v1006_v2, 0.0  ;;  %vm2182_vm5 = vnez %v2135_v17 }
  0xfc   :  { %vm2168_vm15 = vmmov %vm2162_vm4  ;;  %v1010_v5 = vpop.eup %1009  ;;  %v538_v7 = vsel %vm1607_vm11, %v1008_v4, 0.0  ;;  %v638_v54 = vsel %vm2182_vm5, %v1680_v15, 0.0  ;;  %v621_v15 = vld [vmem:[#allocation3 + $0x28] sm:$0xff] }
  0xfd   :  { %vm1698_vm4 = vmand %vm2168_vm15, %vm1655_vm2  ;;  %v1012_v11 = vpop.eup %1011  ;;  %551 = vadd.xlane.f32.xlu0 %v535_v63  ;;  %v545_v13 = vsel %vm1636_vm1, %v1010_v5, 0.0 }
  0xfe   :  { %vm2172_vm6 = vmmov %vm2168_vm15  ;;  %vm2175_vm15 = vnez %v2129_v12  ;;  %v1014_v12 = vpop.eup %1013  ;;  %v537_v16 = vsel %vm1698_vm4, %v1012_v11, 0.0  ;;  %v491_v11 = vld [vmem:[#allocation2 + $0x50] sm:$0xff] }
  0xff   :  { %vm1709_vm12 = vmand %vm2172_vm6, %vm2171_vm13  ;;  %v543_v61 = vsel %vm2175_vm15, %v1004_v55, 0.0  ;;  %v1016_v0 = vpop.eup %1015  ;;  %v482_v55 = vld [vmem:[#allocation2 + $0x8] sm:$0xff] }
 0x100   :  { %vm502_vm2 = vmxor %vm1442_vm3, %vm2094_vm9  ;;  %vm2179_vm3 = vnez %v2123_v3  ;;  %567 = vadd.xlane.f32.xlu1 %v543_v61  ;;  %v1018_v22 = vpop.eup %1017  ;;  %v618_v3 = vld [vmem:[#allocation3 + $0x10] sm:$0xff]  ;;  %v481_v61 = vld [vmem:[#allocation2] sm:$0xff] }
 0x101   :  { %vm2176_vm14 = vmmov %vm2172_vm6  ;;  %v1020_v26 = vpop.eup %1019  ;;  %557 = vadd.xlane.f32.xlu0 %v538_v7 }
 0x102   :  { %vm1722_vm7 = vmand %vm2176_vm14, %vm1687_vm10  ;;  %vm2188_vm14 = vnez %v2161_v47  ;;  %v1022_v29 = vpop.eup %1021  ;;  %v539_v31 = vsel %vm1709_vm12, %v1020_v26, 0.0  ;;  %v1849_v26 = vld [vmem:[%s2062_s5 + $0x18] sm:$0xff] }
 0x103   :  { %vm510_vm13 = vmxor %vm2179_vm3, %vm2094_vm9  ;;  %v547_v28 = vsel %vm1722_vm7, %v1018_v22, 0.0  ;;  %v1024_v37 = vpop.eup %1023 }
 0x104   :  { %vm1735_vm15 = vmand %vm2172_vm6, %vm502_vm2  ;;  %571 = vadd.xlane.f32.xlu1 %v545_v13  ;;  %v1026_v41 = vpop.eup %1025  ;;  %v1837_v13 = vld [vmem:[%s2062_s5 + $0x8] sm:$0xff] }
 0x105   :  { %vm1744_vm10 = vmxor %vm2182_vm5, %vm2094_vm9  ;;  %v540_v9 = vsel %vm1735_vm15, %v1016_v0, 0.0  ;;  %v1028_v60 = vpop.eup %1027  ;;  %573 = vadd.xlane.f32.xlu0 %v546_v32  ;;  %vm2198_vm5 = vnez %v2091_v25  ;;  %v647_v25 = vsel %vm1623_vm8, %v1628_v33, 0.0  ;;  %v844_v22 = vadd.f32 1e-10, %v1837_v13 }
 0x106   :  { %vm2185_vm11 = vmmov %vm2172_vm6  ;;  %v641_v17 = vsel %vm2198_vm5, %v1397_v20, 0.0  ;;  %v645_v20 = vsel %vm2179_vm3, %v1548_v6, 0.0 }
 0x107   :  { %vm1752_vm2 = vmand %vm2185_vm11, %vm510_vm13 }
 0x108   :  { %v548_v50 = vsel %vm1752_vm2, %v1014_v12, 0.0  ;;  %vm512_vm1 = vmxor %vm1623_vm8, %vm2094_vm9  ;;  %559 = vadd.xlane.f32.xlu1 %v539_v31  ;;  %v1843_v12 = vld [vmem:[%s2062_s5] sm:$0xff] }
 0x109   :  { %vm504_vm4 = vmxor %vm1646_vm0, %vm2094_vm9  ;;  %555 = vadd.xlane.f32.xlu0 %v537_v16  ;;  %vm2201_vm0 = vcmask 7168   ;;  %v843_v31 = vadd.f32 1e-10, %v1843_v12 }
 0x10a   :  { %vm511_vm13 = vmxor %vm2188_vm14, %vm2094_vm9 }
 0x10b   :  { %vm1775_vm15 = vmand %vm2172_vm6, %vm512_vm1 }
 0x10c   :  { %vm2191_vm11 = vmmov %vm2172_vm6  ;;  %v550_v40 = vsel %vm1775_vm15, %v1022_v29, 0.0  ;;  %575 = vadd.xlane.f32.xlu1 %v547_v28  ;;  %v485_v28 = vld [vmem:[#allocation2 + $0x20] sm:$0xff] }
 0x10d   :  { %vm1781_vm2 = vmand %vm2191_vm11, %vm504_vm4  ;;  %561 = vadd.xlane.f32.xlu0 %v540_v9  ;;  %vm2196_vm4 = vnez %v2100_v34 }
 0x10e   :  { %vm2194_vm9 = vmmov %vm2172_vm6  ;;  %v542_v42 = vsel %vm1781_vm2, %v1024_v37, 0.0  ;;  %v640_v59 = vsel %vm2196_vm4, %v1429_v27, 0.0  ;;  %v1857_v37 = vld [vmem:[%s2062_s5 + $0x20] sm:$0xff] }
 0x10f   :  { %vm533_vm12 = vmand %vm2194_vm9, %vm511_vm13  ;;  %vm2199_vm13 = vnez %v2139_v18 }
 0x110   :  { %vm2195_vm7 = vmmov %vm2172_vm6  ;;  %v549_v24 = vsel %vm533_vm12, %v1026_v41, 0.0  ;;  %v644_v27 = vsel %vm2199_vm13, %v1598_v21, 0.0  ;;  %vm2200_vm6 = vnez %v2116_v58  ;;  %v616_v58 = vld [vmem:[#allocation3] sm:$0xff] }
 0x111   :  { %vm525_vm1 = vmand %vm2195_vm7, %vm1744_vm10  ;;  %577 = vadd.xlane.f32.xlu0 %v548_v50  ;;  %vm2197_vm10 = vnez %v2105_v44  ;;  %v643_v34 = vsel %vm2200_vm6, %v1467_v39, 0.0  ;;  %v646_v44 = vsel %vm2188_vm14, %v1670_v23, 0.0  ;;  %v492_v50 = vld [vmem:[#allocation2 + $0x58] sm:$0xff] }
 0x112   :  { %v541_v43 = vsel %vm525_vm1, %v1028_v60, 0.0  ;;  %v642_v46 = vsel %vm2197_vm10, %v1491_v45, 0.0  ;;  %v617_v45 = vld [vmem:[#allocation3 + $0x8] sm:$0xff]  ;;  %vm2202_vm14 = vmmov %vm2201_vm0 }
 0x113   :  { %563 = vadd.xlane.f32.xlu1 %v541_v43  ;;  %vm2203_vm3 = vmmov %vm2201_vm0  ;;  %v493_v43 = vld [vmem:[#allocation2 + $0x60] sm:$0xff] }
 0x114   :  { %vm2204_vm8 = vmmov %vm2201_vm0 }
 0x115   :  { %565 = vadd.xlane.f32.xlu0 %v542_v42  ;;  %vm2205_vm15 = vmmov %vm2201_vm0  ;;  %v846_v42 = vadd.f32 1e-10, %v1849_v26 }
 0x116   :  { %vm2206_vm11 = vmmov %vm2201_vm0 }
 0x117   :  { %579 = vadd.xlane.f32.xlu1 %v549_v24  ;;  %vm2207_vm2 = vmmov %vm2201_vm0  ;;  %v483_v24 = vld [vmem:[#allocation2 + $0x10] sm:$0xff] }
 0x118   :  { %vm2208_vm9 = vmmov %vm2201_vm0 }
 0x119   :  { %581 = vadd.xlane.f32.xlu0 %v550_v40  ;;  %vm2209_vm12 = vmmov %vm2201_vm0 }
 0x11a   :  { %vm2210_vm7 = vmmov %vm2201_vm0 }
 0x11b   :  { %660 = vadd.xlane.f32.xlu1 %v638_v54  ;;  %vm2211_vm1 = vmmov %vm2201_vm0 }
 0x11c   :  { %vm2212_vm4 = vmmov %vm2201_vm0 }
 0x11d   :  { %662 = vadd.xlane.f32.xlu0 %v639_v56  ;;  %vm2213_vm10 = vmmov %vm2201_vm0  ;;  %v1865_v56 = vld [vmem:[%s2062_s5 + $0x10] sm:$0xff] }
 0x11e   :  { %vm2214_vm5 = vmmov %vm2201_vm0 }
 0x11f   :  { %664 = vadd.xlane.f32.xlu1 %v640_v59  ;;  %v847_v59 = vadd.f32 1e-10, %v1857_v37  ;;  %vm2215_vm13 = vmmov %vm2201_vm0 }
 0x120   :  { %vm2216_vm6 = vmmov %vm2201_vm0 }
 0x121   :  { %666 = vadd.xlane.f32.xlu0 %v641_v17 }
 0x123   :  { %668 = vadd.xlane.f32.xlu1 %v642_v46  ;;  %v1870_v46 = vld [vmem:[%s2062_s5 + $0x40] sm:$0xff] }
 0x125   :  { %670 = vadd.xlane.f32.xlu0 %v643_v34 }
 0x127   :  { %672 = vadd.xlane.f32.xlu1 %v644_v27  ;;  %v851_v27 = vadd.f32 1e-10, %v1870_v46 }
 0x129   :  { %674 = vadd.xlane.f32.xlu0 %v645_v20  ;;  %v486_v20 = vld [vmem:[#allocation2 + $0x28] sm:$0xff] }
 0x12b   :  { %676 = vadd.xlane.f32.xlu1 %v646_v44 }
 0x12d   :  { %678 = vadd.xlane.f32.xlu0 %v647_v25  ;;  %v1877_v25 = vld [vmem:[%s2062_s5 + $0x28] sm:$0xff] }
 0x170   :  { %v651_v18 = vpop.xlane.xlu0 %650 }
 0x171   :  { %v681_v39 = vadd.f32 %v651_v18, %v617_v45  ;;  %v649_v21 = vpop.xlane.xlu1 %648 }
 0x172   :  { %v680_v35 = vadd.f32 %v649_v21, %v616_v58  ;;  %v845_v58 = vadd.f32 1e-10, %v1865_v56  ;;  %v1883_v21 = vld [vmem:[%s2062_s5 + $0x50] sm:$0xff] }
 0x173   :  { %697 = vst.msk [vmem:[#allocation3 + $0x8] sm:$0xff] %vm2201_vm0, %v681_v39 }
 0x174   :  { %696 = vst.msk [vmem:[#allocation3] sm:$0xff] %vm2202_vm14, %v680_v35  ;;  %vm2217_vm14 = vmmov %vm2201_vm0 }
 0x175   :  { %v655_v47 = vpop.xlane.xlu0 %654 }
 0x176   :  { %v683_v6 = vadd.f32 %v655_v47, %v619_v36  ;;  %v487_v36 = vld [vmem:[#allocation2 + $0x30] sm:$0xff]  ;;  %v853_v47 = vadd.f32 1e-10, %v1883_v21 }
 0x178   :  { %v653_v23 = vpop.xlane.xlu1 %652  ;;  %699 = vst.msk [vmem:[#allocation3 + $0x18] sm:$0xff] %vm2203_vm3, %v683_v6  ;;  %v848_v6 = vadd.f32 1e-10, %v1877_v25  ;;  %vm2218_vm3 = vmmov %vm2201_vm0 }
 0x179   :  { %v682_v30 = vadd.f32 %v653_v23, %v618_v3 }
 0x17b   :  { %698 = vst.msk [vmem:[#allocation3 + $0x10] sm:$0xff] %vm2204_vm8, %v682_v30  ;;  %vm2219_vm8 = vmmov %vm2201_vm0 }
 0x17c   :  { %v659_v33 = vpop.xlane.xlu0 %658 }
 0x17d   :  { %v685_v49 = vadd.f32 %v659_v33, %v621_v15 }
 0x17e   :  { %v657_v51 = vpop.xlane.xlu1 %656 }
 0x17f   :  { %701 = vst.msk [vmem:[#allocation3 + $0x28] sm:$0xff] %vm2205_vm15, %v685_v49  ;;  %v684_v52 = vadd.f32 %v657_v51, %v620_v48  ;;  %v1892_v48 = vld [vmem:[%s2062_s5 + $0x30] sm:$0xff]  ;;  %v494_v51 = vld [vmem:[#allocation2 + $0x68] sm:$0xff]  ;;  %vm2220_vm15 = vmmov %vm2201_vm0 }
 0x181   :  { %700 = vst.msk [vmem:[#allocation3 + $0x20] sm:$0xff] %vm2206_vm11, %v684_v52  ;;  %vm2221_vm11 = vmmov %vm2201_vm0 }
 0x186   :  { %v570_v62 = vpop.xlane.xlu0 %569 }
 0x187   :  { %v592_v63 = vadd.f32 %v570_v62, %v490_v53  ;;  %v495_v62 = vld [vmem:[#allocation2 + $0x70] sm:$0xff] }
 0x188   :  { %v554_v1 = vpop.xlane.xlu1 %553 }
 0x189   :  { %v584_v2 = vadd.f32 %v554_v1, %v482_v55  ;;  %609 = vst.msk [vmem:[#allocation2 + $0x48] sm:$0xff] %vm2207_vm2, %v592_v63  ;;  %vm2222_vm2 = vmmov %vm2201_vm0 }
 0x18a   :  { %v552_v4 = vpop.xlane.xlu0 %551 }
 0x18b   :  { %601 = vst.msk [vmem:[#allocation2 + $0x8] sm:$0xff] %vm2208_vm9, %v584_v2  ;;  %v583_v32 = vadd.f32 %v552_v4, %v481_v61  ;;  %v849_v61 = vadd.f32 1e-10, %v1892_v48  ;;  %vm2223_vm9 = vmmov %vm2201_vm0 }
 0x18d   :  { %v568_v5 = vpop.xlane.xlu1 %567  ;;  %600 = vst.msk [vmem:[#allocation2] sm:$0xff] %vm2209_vm12, %v583_v32  ;;  %vm2224_vm12 = vmmov %vm2201_vm0 }
 0x18e   :  { %v591_v7 = vadd.f32 %v568_v5, %v489_v57  ;;  %v558_v14 = vpop.xlane.xlu0 %557 }
 0x18f   :  { %v586_v16 = vadd.f32 %v558_v14, %v484_v8 }
 0x190   :  { %608 = vst.msk [vmem:[#allocation2 + $0x40] sm:$0xff] %vm2210_vm7, %v591_v7  ;;  %v740_v52 = vld [vmem:[#allocation2 + $0x48] sm:$0xff]  ;;  %vm2225_vm7 = vmmov %vm2201_vm0 }
 0x191   :  { %v572_v19 = vpop.xlane.xlu1 %571  ;;  %603 = vst.msk [vmem:[#allocation2 + $0x18] sm:$0xff] %vm2211_vm1, %v586_v16  ;;  %v1900_v7 = vld [vmem:[%s2062_s5 + $0x48] sm:$0xff]  ;;  %vm2226_vm1 = vmmov %vm2201_vm0 }
 0x192   :  { %v593_v0 = vadd.f32 %v572_v19, %v491_v11  ;;  %v732_v9 = vld [vmem:[#allocation2 + $0x8] sm:$0xff]  ;;  %v574_v10 = vpop.xlane.xlu0 %573  ;;  %v756_v11 = vadd.f32 1e-10, %v740_v52  ;;  %v488_v19 = vld [vmem:[#allocation2 + $0x38] sm:$0xff] }
 0x193   :  { %v748_v29 = vadd.f32 1e-10, %v732_v9  ;;  %v594_v38 = vadd.f32 %v574_v10, %v492_v50 }
 0x194   :  { %610 = vst.msk [vmem:[#allocation2 + $0x50] sm:$0xff] %vm2212_vm4, %v593_v0  ;;  %v731_v41 = vld [vmem:[#allocation2] sm:$0xff]  ;;  %v622_v0 = vld [vmem:[#allocation3 + $0x30] sm:$0xff]  ;;  %vm2227_vm4 = vmmov %vm2201_vm0 }
 0x195   :  { %v560_v40 = vpop.xlane.xlu1 %559  ;;  %1029 = vlog2.f32 %v748_v29  ;;  %v747_v54 = vadd.f32 1e-10, %v731_v41  ;;  %611 = vst.msk [vmem:[#allocation2 + $0x58] sm:$0xff] %vm2213_vm10, %v594_v38  ;;  %v852_v29 = vadd.f32 1e-10, %v1900_v7  ;;  %v796_v38 = vld [vmem:[#allocation3 + $0x8] sm:$0xff]  ;;  %vm2228_vm10 = vmmov %vm2201_vm0 }
 0x196   :  { %v587_v60 = vadd.f32 %v560_v40, %v485_v28  ;;  %1031 = vrcp.f32 %v844_v22  ;;  %v556_v17 = vpop.xlane.xlu0 %555 }
 0x197   :  { %1033 = vrcp.f32 %v843_v31  ;;  %v585_v34 = vadd.f32 %v556_v17, %v483_v24  ;;  %v739_v45 = vld [vmem:[#allocation2 + $0x40] sm:$0xff] }
 0x198   :  { %604 = vst.msk [vmem:[#allocation2 + $0x20] sm:$0xff] %vm2214_vm5, %v587_v60  ;;  %1035 = vlog2.f32 %v747_v54  ;;  %v734_v18 = vld [vmem:[#allocation2 + $0x18] sm:$0xff]  ;;  %v755_v15 = vadd.f32 1e-10, %v739_v45  ;;  %v1908_v31 = vld [vmem:[%s2062_s5 + $0x60] sm:$0xff]  ;;  %vm2229_vm5 = vmmov %vm2201_vm0 }
 0x199   :  { %v576_v44 = vpop.xlane.xlu1 %575  ;;  %1037 = vrcp.f32 %v846_v42  ;;  %v750_v35 = vadd.f32 1e-10, %v734_v18  ;;  %602 = vst.msk [vmem:[#allocation2 + $0x10] sm:$0xff] %vm2215_vm13, %v585_v34  ;;  %v855_v45 = vadd.f32 1e-10, %v1908_v31  ;;  %vm2230_vm13 = vmmov %vm2201_vm0 }
 0x19a   :  { %v595_v39 = vadd.f32 %v576_v44, %v493_v43  ;;  %1039 = vrcp.f32 %v847_v59  ;;  %v562_v23 = vpop.xlane.xlu0 %561  ;;  %v496_v44 = vld [vmem:[#allocation2 + $0x78] sm:$0xff] }
 0x19b   :  { %v741_v3 = vld [vmem:[#allocation2 + $0x50] sm:$0xff]  ;;  %1041 = vrcp.f32 %v851_v27  ;;  %v588_v30 = vadd.f32 %v562_v23, %v486_v20  ;;  %v624_v20 = vld [vmem:[#allocation3 + $0x40] sm:$0xff] }
 0x19c   :  { %612 = vst.msk [vmem:[#allocation2 + $0x60] sm:$0xff] %vm2216_vm6, %v595_v39  ;;  %1043 = vlog2.f32 %v750_v35  ;;  %v757_v53 = vadd.f32 1e-10, %v741_v3  ;;  %v742_v41 = vld [vmem:[#allocation2 + $0x58] sm:$0xff]  ;;  %vm2231_vm6 = vmmov %vm2201_vm0 }
 0x19d   :  { %1045 = vrcp.f32 %v845_v58  ;;  %605 = vst.msk [vmem:[#allocation2 + $0x28] sm:$0xff] %vm2201_vm0, %v588_v30  ;;  %v795_v58 = vld [vmem:[#allocation3] sm:$0xff]  ;;  %v758_v35 = vadd.f32 1e-10, %v742_v41  ;;  %v1926_v30 = vld [vmem:[%s2062_s5 + $0x38] sm:$0xff] }
 0x19e   :  { %1047 = vrcp.f32 %v853_v47  ;;  %v578_v2 = vpop.xlane.xlu0 %577 }
 0x19f   :  { %v735_v55 = vld [vmem:[#allocation2 + $0x20] sm:$0xff]  ;;  %v1030_v63 = vpop.eup %1029  ;;  %1049 = vrcp.f32 %v848_v6  ;;  %v596_v32 = vadd.f32 %v578_v2, %v494_v51 }
 0x1a0   :  { %v564_v33 = vpop.xlane.xlu1 %563  ;;  %v751_v1 = vadd.f32 1e-10, %v735_v55  ;;  %v1032_v57 = vpop.eup %1031  ;;  %v766_v4 = vmul.f32 0.6931472, %v1030_v63  ;;  %1051 = vlog2.f32 %v755_v15  ;;  %v733_v14 = vld [vmem:[#allocation2 + $0x10] sm:$0xff] }
 0x1a1   :  { %v589_v49 = vadd.f32 %v564_v33, %v487_v36  ;;  %v1034_v8 = vpop.eup %1033  ;;  %v749_v9 = vadd.f32 1e-10, %v733_v14  ;;  %613 = vst.msk [vmem:[#allocation2 + $0x68] sm:$0xff] %vm2218_vm3, %v596_v32  ;;  %v1931_v33 = vld [vmem:[%s2062_s5 + $0x58] sm:$0xff]  ;;  %vm2233_vm3 = vmmov %vm2201_vm0 }
 0x1a2   :  { %1053 = vlog2.f32 %v751_v1  ;;  %v1036_v50 = vpop.eup %1035  ;;  %v812_v22 = vmul.f32 %v766_v4, %v1837_v13  ;;  %v566_v13 = vpop.xlane.xlu0 %565  ;;  %v798_v4 = vld [vmem:[#allocation3 + $0x18] sm:$0xff] }
 0x1a3   :  { %606 = vst.msk [vmem:[#allocation2 + $0x30] sm:$0xff] %vm2217_vm14, %v589_v49  ;;  %1055 = vlog2.f32 %v757_v53  ;;  %v743_v28 = vld [vmem:[#allocation2 + $0x60] sm:$0xff]  ;;  %v1910_v10 = vpop.eup %1037  ;;  %v764_v40 = vmul.f32 0.6931472, %v1036_v50  ;;  %v590_v43 = vadd.f32 %v566_v13, %v488_v19  ;;  %v854_v53 = vadd.f32 1e-10, %v1931_v33  ;;  %vm2232_vm14 = vmmov %vm2201_vm0 }
 0x1a4   :  { %v580_v5 = vpop.xlane.xlu1 %579  ;;  %v759_v42 = vadd.f32 1e-10, %v743_v28  ;;  %1057 = vrcp.f32 %v849_v61  ;;  %v1913_v60 = vpop.eup %1039  ;;  %v828_v24 = vsub.f32 %v796_v38, %v812_v22  ;;  %v736_v27 = vld [vmem:[#allocation2 + $0x28] sm:$0xff]  ;;  %v623_v61 = vld [vmem:[#allocation3 + $0x38] sm:$0xff] }
 0x1a5   :  { %v597_v16 = vadd.f32 %v580_v5, %v495_v62  ;;  %1059 = vlog2.f32 %v749_v9  ;;  %v1915_v59 = vpop.eup %1041  ;;  %v811_v17 = vmul.f32 %v764_v40, %v1843_v12  ;;  %v752_v36 = vadd.f32 1e-10, %v736_v27  ;;  %607 = vst.msk [vmem:[#allocation2 + $0x38] sm:$0xff] %vm2220_vm15, %v590_v43  ;;  %v625_v13 = vld [vmem:[#allocation3 + $0x48] sm:$0xff]  ;;  %vm2235_vm15 = vmmov %vm2201_vm0 }
 0x1a6   :  { %1061 = vlog2.f32 %v756_v11  ;;  %v1044_v18 = vpop.eup %1043  ;;  %v862_v39 = vmul.f32 %v1032_v57, %v828_v24  ;;  %v582_v15 = vpop.xlane.xlu0 %581  ;;  %v850_v5 = vadd.f32 1e-10, %v1926_v30  ;;  %v626_v11 = vld [vmem:[#allocation3 + $0x50] sm:$0xff] }
 0x1a7   :  { %614 = vst.msk [vmem:[#allocation2 + $0x70] sm:$0xff] %vm2219_vm8, %v597_v16  ;;  %1063 = vrcp.f32 %v852_v29  ;;  %v1920_v3 = vpop.eup %1045  ;;  %v827_v6 = vsub.f32 %v795_v58, %v811_v17  ;;  %v770_v23 = vmul.f32 0.6931472, %v1044_v18  ;;  %v598_v51 = vadd.f32 %v582_v15, %v496_v44  ;;  %v628_v17 = vld [vmem:[#allocation3 + $0x60] sm:$0xff]  ;;  %v627_v15 = vld [vmem:[#allocation3 + $0x58] sm:$0xff]  ;;  %vm2234_vm8 = vmmov %vm2201_vm0 }
 0x1a8   :  { %v661_v54 = vpop.xlane.xlu1 %660  ;;  %1065 = vlog2.f32 %v759_v42  ;;  %v1933_v49 = vpop.eup %1047  ;;  %892 = vst.msk [vmem:[%s2063_s6 + $0x8] sm:$0xff] %vm2222_vm2, %v862_v39  ;;  %v744_v1 = vld [vmem:[#allocation2 + $0x68] sm:$0xff]  ;;  %v799_v44 = vld [vmem:[#allocation3 + $0x20] sm:$0xff]  ;;  %vm2237_vm2 = vmmov %vm2201_vm0 }
 0x1a9   :  { %v686_v34 = vadd.f32 %v661_v54, %v622_v0  ;;  %1067 = vlog2.f32 %v752_v36  ;;  %v1940_v55 = vpop.eup %1049  ;;  %v860_v62 = vmul.f32 %v1034_v8, %v827_v6  ;;  %v814_v63 = vmul.f32 %v770_v23, %v1849_v26  ;;  %615 = vst.msk [vmem:[#allocation2 + $0x78] sm:$0xff] %vm2223_vm9, %v598_v51  ;;  %v1953_v0 = vld [vmem:[%s2062_s5 + $0x70] sm:$0xff]  ;;  %vm2238_vm9 = vmmov %vm2201_vm0 }
 0x1aa   :  { %v737_v47 = vld [vmem:[#allocation2 + $0x30] sm:$0xff]  ;;  %v1052_v57 = vpop.eup %1051  ;;  %v760_v8 = vadd.f32 1e-10, %v744_v1  ;;  %v663_v19 = vpop.xlane.xlu0 %662  ;;  %v857_v27 = vadd.f32 1e-10, %v1953_v0 }
 0x1ab   :  { %v753_v12 = vadd.f32 1e-10, %v737_v47  ;;  %702 = vst.msk [vmem:[#allocation3 + $0x30] sm:$0xff] %vm2221_vm11, %v686_v34  ;;  %v830_v26 = vsub.f32 %v798_v4, %v814_v63  ;;  %v687_v9 = vadd.f32 %v663_v19, %v623_v61  ;;  %v780_v38 = vmul.f32 0.6931472, %v1052_v57  ;;  %v1964_v34 = vld [vmem:[%s2062_s5 + $0x68] sm:$0xff]  ;;  %vm2236_vm11 = vmmov %vm2201_vm0 }
 0x1ac   :  { %v665_v52 = vpop.xlane.xlu1 %664  ;;  %v1054_v14 = vpop.eup %1053  ;;  %891 = vst.msk [vmem:[%s2063_s6] sm:$0xff] %vm2224_vm12, %v860_v62  ;;  %v738_v41 = vld [vmem:[#allocation2 + $0x38] sm:$0xff]  ;;  %v630_v51 = vld [vmem:[#allocation3 + $0x70] sm:$0xff]  ;;  %vm2239_vm12 = vmmov %vm2201_vm0 }
 0x1ad   :  { %1069 = vlog2.f32 %v753_v12  ;;  %v688_v2 = vadd.f32 %v665_v52, %v624_v20  ;;  %v1056_v50 = vpop.eup %1055  ;;  %v772_v22 = vmul.f32 0.6931472, %v1054_v14  ;;  %v866_v40 = vmul.f32 %v1910_v10, %v830_v26  ;;  %703 = vst.msk [vmem:[#allocation3 + $0x38] sm:$0xff] %vm2226_vm1, %v687_v9  ;;  %v797_v62 = vld [vmem:[#allocation3 + $0x10] sm:$0xff]  ;;  %vm2241_vm1 = vmmov %vm2201_vm0 }
 0x1ae   :  { %v745_v32 = vld [vmem:[#allocation2 + $0x70] sm:$0xff]  ;;  %1071 = vrcp.f32 %v855_v45  ;;  %v1955_v29 = vpop.eup %1057  ;;  %v754_v54 = vadd.f32 1e-10, %v738_v41  ;;  %v667_v45 = vpop.xlane.xlu0 %666  ;;  %v819_v23 = vmul.f32 %v780_v38, %v1870_v46  ;;  %v856_v52 = vadd.f32 1e-10, %v1964_v34 }
 0x1af   :  { %1073 = vlog2.f32 %v758_v35  ;;  %v761_v16 = vadd.f32 1e-10, %v745_v32  ;;  %704 = vst.msk [vmem:[#allocation3 + $0x40] sm:$0xff] %vm2225_vm7, %v688_v2  ;;  %v1060_v24 = vpop.eup %1059  ;;  %v815_v43 = vmul.f32 %v772_v22, %v1857_v37  ;;  %v784_v37 = vmul.f32 0.6931472, %v1056_v50  ;;  %vm2240_vm7 = vmmov %vm2201_vm0 }
 0x1b0   :  { %v669_v28 = vpop.xlane.xlu1 %668  ;;  %1075 = vrcp.f32 %v854_v53  ;;  %v1062_v10 = vpop.eup %1061  ;;  %894 = vst.msk [vmem:[%s2063_s6 + $0x18] sm:$0xff] %vm2227_vm4, %v866_v40  ;;  %v768_v20 = vmul.f32 0.6931472, %v1060_v24  ;;  %v689_v39 = vadd.f32 %v667_v45, %v625_v13  ;;  %v746_v6 = vld [vmem:[#allocation2 + $0x78] sm:$0xff]  ;;  %v800_v40 = vld [vmem:[#allocation3 + $0x28] sm:$0xff]  ;;  %vm2242_vm4 = vmmov %vm2201_vm0 }
 0x1b1   :  { %1077 = vlog2.f32 %v761_v16  ;;  %v690_v42 = vadd.f32 %v669_v28, %v626_v11  ;;  %v1971_v18 = vpop.eup %1063  ;;  %v831_v58 = vsub.f32 %v799_v44, %v815_v43  ;;  %v782_v63 = vmul.f32 0.6931472, %v1062_v10  ;;  %v1987_v16 = vld [vmem:[%s2062_s5 + $0x78] sm:$0xff]  ;;  %v629_v28 = vld [vmem:[#allocation3 + $0x68] sm:$0xff] }
 0x1b2   :  { %1079 = vrcp.f32 %v850_v5  ;;  %v1066_v36 = vpop.eup %1065  ;;  %v813_v47 = vmul.f32 %v768_v20, %v1865_v56  ;;  %v762_v2 = vadd.f32 1e-10, %v746_v6  ;;  %705 = vst.msk [vmem:[#allocation3 + $0x48] sm:$0xff] %vm2229_vm5, %v689_v39  ;;  %v821_v46 = vmul.f32 %v784_v37, %v1883_v21  ;;  %v671_v5 = vpop.xlane.xlu0 %670  ;;  %v801_v24 = vld [vmem:[#allocation3 + $0x30] sm:$0xff]  ;;  %vm2244_vm5 = vmmov %vm2201_vm0 }
 0x1b3   :  { %1081 = vlog2.f32 %v760_v8  ;;  %706 = vst.msk [vmem:[#allocation3 + $0x50] sm:$0xff] %vm2228_vm10, %v690_v42  ;;  %v1068_v53 = vpop.eup %1067  ;;  %v868_v1 = vmul.f32 %v1913_v60, %v831_v58  ;;  %v788_v60 = vmul.f32 0.6931472, %v1066_v36  ;;  %v691_v26 = vadd.f32 %v671_v5, %v627_v15  ;;  %vm2243_vm10 = vmmov %vm2201_vm0 }
 0x1b4   :  { %1083 = vlog2.f32 %v754_v54  ;;  %v673_v35 = vpop.xlane.xlu1 %672  ;;  %v829_v56 = vsub.f32 %v797_v62, %v813_v47  ;;  %v774_v4 = vmul.f32 0.6931472, %v1068_v53 }
 0x1b5   :  { %v692_v12 = vadd.f32 %v673_v35, %v628_v17  ;;  %1085 = vrcp.f32 %v857_v27  ;;  %895 = vst.msk [vmem:[%s2063_s6 + $0x20] sm:$0xff] %vm2231_vm6, %v868_v1  ;;  %v820_v27 = vmul.f32 %v782_v63, %v1900_v7  ;;  %v823_v39 = vmul.f32 %v788_v60, %v1908_v31  ;;  %v631_v35 = vld [vmem:[#allocation3 + $0x78] sm:$0xff]  ;;  %vm2246_vm6 = vmmov %vm2201_vm0 }
 0x1b6   :  { %v803_v61 = vld [vmem:[#allocation3 + $0x40] sm:$0xff]  ;;  %1087 = vlog2.f32 %v762_v2  ;;  %v864_v19 = vmul.f32 %v1920_v3, %v829_v56  ;;  %v816_v50 = vmul.f32 %v774_v4, %v1877_v25  ;;  %707 = vst.msk [vmem:[#allocation3 + $0x58] sm:$0xff] %vm2201_vm0, %v691_v26  ;;  %v802_v2 = vld [vmem:[#allocation3 + $0x38] sm:$0xff] }
 0x1b7   :  { %v1070_v57 = vpop.eup %1069  ;;  %v835_v32 = vsub.f32 %v803_v61, %v819_v23  ;;  %708 = vst.msk [vmem:[#allocation3 + $0x60] sm:$0xff] %vm2230_vm13, %v692_v12  ;;  %1089 = vrcp.f32 %v856_v52  ;;  %vm2245_vm13 = vmmov %vm2201_vm0 }
 0x1b8   :  { %v1072_v11 = vpop.eup %1071  ;;  %v776_v14 = vmul.f32 0.6931472, %v1070_v57  ;;  %v677_v8 = vpop.xlane.xlu1 %676  ;;  %893 = vst.msk [vmem:[%s2063_s6 + $0x10] sm:$0xff] %vm2232_vm14, %v864_v19  ;;  %v832_v3 = vsub.f32 %v800_v40, %v816_v50 }
 0x1b9   :  { %v1074_v21 = vpop.eup %1073  ;;  %v876_v22 = vmul.f32 %v1915_v59, %v835_v32  ;;  %v694_v9 = vadd.f32 %v677_v8, %v630_v51  ;;  %v858_v59 = vadd.f32 1e-10, %v1987_v16  ;;  %v804_v58 = vld [vmem:[#allocation3 + $0x48] sm:$0xff] }
 0x1ba   :  { %v1076_v38 = vpop.eup %1075  ;;  %v817_v41 = vmul.f32 %v776_v14, %v1892_v48  ;;  %v805_v42 = vld [vmem:[#allocation3 + $0x50] sm:$0xff]  ;;  %v675_v48 = vpop.xlane.xlu0 %674  ;;  %v786_v54 = vmul.f32 0.6931472, %v1074_v21  ;;  %v870_v37 = vmul.f32 %v1940_v55, %v832_v3  ;;  %v836_v6 = vsub.f32 %v804_v58, %v820_v27 }
 0x1bb   :  { %v1078_v13 = vpop.eup %1077  ;;  %899 = vst.msk [vmem:[%s2063_s6 + $0x40] sm:$0xff] %vm2233_vm3, %v876_v22  ;;  %v837_v25 = vsub.f32 %v805_v42, %v821_v46  ;;  %v693_v10 = vadd.f32 %v675_v48, %v629_v28  ;;  %1091 = vrcp.f32 %v858_v59 }
 0x1bc   :  { %710 = vst.msk [vmem:[#allocation3 + $0x70] sm:$0xff] %vm2234_vm8, %v694_v9  ;;  %v1080_v43 = vpop.eup %1079  ;;  %v833_v17 = vsub.f32 %v801_v24, %v817_v41  ;;  %v792_v20 = vmul.f32 0.6931472, %v1078_v13  ;;  %v878_v12 = vmul.f32 %v1971_v18, %v836_v6  ;;  %v822_v15 = vmul.f32 %v786_v54, %v1931_v33 }
 0x1bd   :  { %v1082_v44 = vpop.eup %1081  ;;  %v880_v45 = vmul.f32 %v1933_v49, %v837_v25  ;;  %709 = vst.msk [vmem:[#allocation3 + $0x68] sm:$0xff] %vm2235_vm15, %v693_v10  ;;  %v806_v62 = vld [vmem:[#allocation3 + $0x58] sm:$0xff] }
 0x1be   :  { %v1084_v36 = vpop.eup %1083  ;;  %v872_v47 = vmul.f32 %v1955_v29, %v833_v17  ;;  %v807_v23 = vld [vmem:[#allocation3 + $0x60] sm:$0xff]  ;;  %896 = vst.msk [vmem:[%s2063_s6 + $0x28] sm:$0xff] %vm2236_vm11, %v870_v37  ;;  %v679_v49 = vpop.xlane.xlu0 %678  ;;  %v790_v29 = vmul.f32 0.6931472, %v1082_v44  ;;  %v825_v63 = vmul.f32 %v792_v20, %v1953_v0  ;;  %v838_v61 = vsub.f32 %v806_v62, %v822_v15 }
 0x1bf   :  { %v778_v7 = vmul.f32 0.6931472, %v1084_v36  ;;  %901 = vst.msk [vmem:[%s2063_s6 + $0x50] sm:$0xff] %vm2237_vm2, %v880_v45  ;;  %v839_v31 = vsub.f32 %v807_v23, %v823_v39  ;;  %v1086_v55 = vpop.eup %1085  ;;  %v695_v51 = vadd.f32 %v679_v49, %v631_v35 }
 0x1c0   :  { %897 = vst.msk [vmem:[%s2063_s6 + $0x30] sm:$0xff] %vm2238_vm9, %v872_v47  ;;  %v1088_v1 = vpop.eup %1087  ;;  %v882_v0 = vmul.f32 %v1076_v38, %v838_v61  ;;  %v824_v56 = vmul.f32 %v790_v29, %v1964_v34 }
 0x1c1   :  { %v818_v52 = vmul.f32 %v778_v7, %v1926_v30  ;;  %v884_v53 = vmul.f32 %v1072_v11, %v839_v31  ;;  %900 = vst.msk [vmem:[%s2063_s6 + $0x48] sm:$0xff] %vm2239_vm12, %v878_v12  ;;  %v794_v33 = vmul.f32 0.6931472, %v1088_v1  ;;  %v1090_v4 = vpop.eup %1089 }
 0x1c2   :  { %711 = vst.msk [vmem:[#allocation3 + $0x78] sm:$0xff] %vm2240_vm7, %v695_v51 }
 0x1c3   :  { %v809_v57 = vld [vmem:[#allocation3 + $0x70] sm:$0xff]  ;;  %v834_v18 = vsub.f32 %v802_v2, %v818_v52  ;;  %903 = vst.msk [vmem:[%s2063_s6 + $0x60] sm:$0xff] %vm2241_vm1, %v884_v53  ;;  %v826_v60 = vmul.f32 %v794_v33, %v1987_v16 }
 0x1c4   :  { %v841_v30 = vsub.f32 %v809_v57, %v825_v63  ;;  %v808_v5 = vld [vmem:[#allocation3 + $0x68] sm:$0xff]  ;;  %902 = vst.msk [vmem:[%s2063_s6 + $0x58] sm:$0xff] %vm2242_vm4, %v882_v0 }
 0x1c5   :  { %v874_v32 = vmul.f32 %v1080_v43, %v834_v18  ;;  %v840_v11 = vsub.f32 %v808_v5, %v824_v56  ;;  %v1092_v14 = vpop.eup %1091 }
 0x1c6   :  { %v888_v46 = vmul.f32 %v1086_v55, %v841_v30 }
 0x1c7   :  { %898 = vst.msk [vmem:[%s2063_s6 + $0x38] sm:$0xff] %vm2243_vm10, %v874_v32  ;;  %v886_v34 = vmul.f32 %v1090_v4, %v840_v11 }
 0x1c8   :  { %905 = vst.msk [vmem:[%s2063_s6 + $0x70] sm:$0xff] %vm2244_vm5, %v888_v46 }
 0x1c9   :  { %v810_v26 = vld [vmem:[#allocation3 + $0x78] sm:$0xff]  ;;  %904 = vst.msk [vmem:[%s2063_s6 + $0x68] sm:$0xff] %vm2245_vm13, %v886_v34 }
 0x1ca   :  { %v842_v8 = vsub.f32 %v810_v26, %v826_v60 }
 0x1cc   :  { %v890_v21 = vmul.f32 %v1092_v14, %v842_v8 }
 0x1ce   :  { %906 = vst.msk [vmem:[%s2063_s6 + $0x78] sm:$0xff] %vm2246_vm6, %v890_v21 }

</bundles_post_ra>
